<compile_context>
chip_gen: v7x
topology: tpu7x:2x2x1
jax: 0.10.0
libtpu: 0.0.40
codegen_flags: <defaults>
</compile_context>

<pallas_src>
import math
import jax
import jax.numpy as jnp
from jax.experimental import pallas as pl
from jax.experimental.pallas import tpu as pltpu


def _round_up(x, m):
    return ((x + m - 1) // m) * m


def _cdiv(a, b):
    return (a + b - 1) // b


def _padded_tile_bytes(rows, cols, itemsize):
    # VMEM layout pads the last two dims to (8, 128).
    return _round_up(max(rows, 1), 8) * _round_up(max(cols, 1), 128) * itemsize


def _multi_tensorcore_chip():
    """True on chips where a ("parallel",) grid axis can shard across multiple
    TensorCores (v7x: 2 TCs/chip, v4 megacore).  v5e/v6e are single-TC."""
    try:
        kind = jax.devices()[0].device_kind.lower()
    except Exception:
        return False
    return any(tag in kind for tag in ("v7", "7x", "v4"))


# --------------------------------------------------------------------------- #
# Kernel
# --------------------------------------------------------------------------- #
def _dense_mlp_kernel(x_ref, w1_ref, b1_ref, w2_ref, b2_ref, w3_ref, b3_ref, o_ref):
    n_out = o_ref.shape[-1]

    # Activation cast happens in-kernel (VPU, free once the tile is in VMEM).
    x = x_ref[...].astype(jnp.bfloat16)

    # features1 = relu(x @ W1 + b1): bf16 MXU operands, f32 accumulation,
    # intermediates kept in f32 for closer parity with the f32 reference.
    h1 = jnp.dot(x, w1_ref[...].astype(jnp.bfloat16),
                 preferred_element_type=jnp.float32) + b1_ref[...]
    h1 = jnp.maximum(h1, 0.0)

    # features2 = relu(h1 @ W2 + b2)
    h2 = jnp.dot(h1.astype(jnp.bfloat16), w2_ref[...].astype(jnp.bfloat16),
                 preferred_element_type=jnp.float32) + b2_ref[...]
    h2 = jnp.maximum(h2, 0.0)

    # a = h2 @ W3 + b3  (lane-padded matmul N, but only the true n_output
    # columns are stored — 8x fewer HBM bytes on the dominant write path).
    a = jnp.dot(h2.astype(jnp.bfloat16), w3_ref[...].astype(jnp.bfloat16),
                preferred_element_type=jnp.float32) + b3_ref[...]
    o_ref[...] = a[:, :n_out]


# --------------------------------------------------------------------------- #
# Wrapper
# --------------------------------------------------------------------------- #
def dense_network_forward(state, params, n_output, *, block_b=None):
    """Forward pass of DenseNetwork.

    state:  (B, 1, n_input) or (B, n_input), any float dtype.
    params: dict with f32 weights, feature dims lane-padded to 128:
              w1 (n_in, Fp), b1 (1, Fp), w2 (Fp, Fp), b2 (1, Fp),
              w3 (Fp, Op), b3 (1, Op)   with Op = round_up(n_output, 128).
    n_output: true (unpadded) output width; kernel writes exactly this width.
    """
    # torch.squeeze(state, 1); the .float()/.bfloat16 cast is done in-kernel.
    if state.ndim == 3 and state.shape[1] == 1:
        x = jnp.squeeze(state, axis=1)
    else:
        x = state

    B, n_in = x.shape
    n_feat_p = params["w1"].shape[1]
    n_out_p = params["w3"].shape[1]          # lane-padded matmul width (>= n_output)
    x_item = jnp.dtype(x.dtype).itemsize

    weights = (params["w1"], params["b1"], params["w2"], params["b2"],
               params["w3"], params["b3"])

    # Resident (double-buffered) weight/bias footprint in VMEM.
    weight_vmem = 2 * sum(
        _padded_tile_bytes(p.shape[0], p.shape[1], jnp.dtype(p.dtype).itemsize)
        for p in weights)

    def tile_vmem(bb):
        return (2 * _padded_tile_bytes(bb, n_in, x_item)       # x double buffer
                + 2 * _padded_tile_bytes(bb, n_output, 4)      # out double buffer
                + 4 * _padded_tile_bytes(bb, n_feat_p, 4))     # live f32/bf16 intermediates

    if block_b is None:
        cap = 2048                                   # amortize ~0.35us/step overhead
        align = 256 if B >= 256 else (16 if B >= 16 else 8)
        block_b = min(cap, _round_up(B, align))
        if block_b >= B:
            block_b = B                              # single full-batch tile (always legal)
        # Multi-TC chips only: force >=2 grid steps so the ("parallel",) batch
        # axis can shard across TensorCores — but never shrink tiles when the
        # grid already has >=2 steps, and never on single-TC v5e/v6e.
        if _multi_tensorcore_chip() and B >= 32 and _cdiv(B, block_b) < 2:
            block_b = max(8, _round_up(_cdiv(B, 2), min(align, 256)))
        # VMEM budget loop (conservative; the explicit vmem_limit below covers
        # v5e's 16 MiB scoped default and fits v7x's 64 MiB physical VMEM).
        budget = 24 * 1024 * 1024
        while block_b > 8 and weight_vmem + tile_vmem(block_b) > budget:
            block_b = max(8, _round_up(block_b // 2, 8))
        # TODO(synk): if n_features grows so large that resident weights alone
        # exceed the budget (e.g. Fp=4096 on v7x), add a feature-tiled fallback
        # (extra "arbitrary" K grid axis + f32 VMEM accumulator) instead of
        # only shrinking block_b.

    grid = (_cdiv(B, block_b),)

    footprint = weight_vmem + tile_vmem(block_b)
    vmem_limit = int(min(100 * 1024 * 1024,
                         max(16 * 1024 * 1024,
                             footprint * 3 // 2 + 4 * 1024 * 1024)))

    flops = 2 * B * (n_in * n_feat_p + n_feat_p * n_feat_p + n_feat_p * n_out_p)
    bytes_accessed = (B * n_in * x_item + B * n_output * 4
                      + sum(p.size * jnp.dtype(p.dtype).itemsize for p in weights))

    out = pl.pallas_call(
        _dense_mlp_kernel,
        out_shape=jax.ShapeDtypeStruct((B, n_output), jnp.float32),
        grid_spec=pltpu.PrefetchScalarGridSpec(
            num_scalar_prefetch=0,
            grid=grid,
            in_specs=[
                pl.BlockSpec((block_b, n_in), lambda i: (i, 0)),       # x tile
                pl.BlockSpec((n_in, n_feat_p), lambda i: (0, 0)),      # W1 (resident)
                pl.BlockSpec((1, n_feat_p), lambda i: (0, 0)),         # b1
                pl.BlockSpec((n_feat_p, n_feat_p), lambda i: (0, 0)),  # W2
                pl.BlockSpec((1, n_feat_p), lambda i: (0, 0)),         # b2
                pl.BlockSpec((n_feat_p, n_out_p), lambda i: (0, 0)),   # W3
                pl.BlockSpec((1, n_out_p), lambda i: (0, 0)),          # b3
            ],
            out_specs=pl.BlockSpec((block_b, n_output), lambda i: (i, 0)),
        ),
        compiler_params=pltpu.CompilerParams(
            dimension_semantics=("parallel",),
            vmem_limit_bytes=vmem_limit),
        cost_estimate=pl.CostEstimate(flops=flops, transcendentals=0,
                                      bytes_accessed=bytes_accessed),
    )(x, params["w1"], params["b1"], params["w2"], params["b2"],
      params["w3"], params["b3"])

    return out


# --------------------------------------------------------------------------- #
# Init (weights stored transposed (in, out), f32, feature dims zero-padded to
# 128 lanes; padded rows/cols are zero so results are exact)
# --------------------------------------------------------------------------- #
def _xavier_uniform(key, fan_in, fan_out, gain):
    bound = gain * math.sqrt(6.0 / (fan_in + fan_out))
    return jax.random.uniform(key, (fan_in, fan_out), jnp.float32, -bound, bound)


def _linear_bias(key, fan_in, fan_out):
    # torch nn.Linear default bias init: U(-1/sqrt(fan_in), 1/sqrt(fan_in))
    bound = 1.0 / math.sqrt(fan_in)
    return jax.random.uniform(key, (1, fan_out), jnp.float32, -bound, bound)


def _pad2(a, rows, cols):
    out = jnp.zeros((rows, cols), a.dtype)
    return out.at[: a.shape[0], : a.shape[1]].set(a)


def init_dense_network_params(key, n_input, n_features, n_output):
    k1, k2, k3, k4, k5, k6 = jax.random.split(key, 6)
    relu_gain = math.sqrt(2.0)   # nn.init.calculate_gain('relu')
    lin_gain = 1.0               # nn.init.calculate_gain('linear')

    n_feat_p = max(_round_up(n_features, 128), 128)
    n_out_p = max(_round_up(n_output, 128), 128)

    w1 = _xavier_uniform(k1, n_input, n_features, relu_gain)
    b1 = _linear_bias(k2, n_input, n_features)
    w2 = _xavier_uniform(k3, n_features, n_features, relu_gain)
    b2 = _linear_bias(k4, n_features, n_features)
    w3 = _xavier_uniform(k5, n_features, n_output, lin_gain)
    b3 = _linear_bias(k6, n_features, n_output)

    return {
        "w1": _pad2(w1, n_input, n_feat_p),
        "b1": _pad2(b1, 1, n_feat_p),
        "w2": _pad2(w2, n_feat_p, n_feat_p),
        "b2": _pad2(b2, 1, n_feat_p),
        "w3": _pad2(w3, n_feat_p, n_out_p),
        "b3": _pad2(b3, 1, n_out_p),
    }


if __name__ == "__main__":
    # DenseNetwork(input_shape=(32,), output_shape=(16,), n_features=64)
    B, n_input, n_features, n_output = 8, 32, 64, 16

    key = jax.random.PRNGKey(0)
    pkey, xkey = jax.random.split(key)
    params = init_dense_network_params(pkey, n_input, n_features, n_output)

    # state shaped (B, 1, n_input), as implied by torch.squeeze(state, 1)
    state = jax.random.normal(xkey, (B, 1, n_input), jnp.float32)

    out = dense_network_forward(state, params, n_output)
    out = jax.block_until_ready(out)

    # Pure-JAX reference mirroring the kernel's bf16-operand / f32-accumulate path.
    x = jnp.squeeze(state, axis=1)

    def mm(a, w):
        return jnp.dot(a.astype(jnp.bfloat16), w.astype(jnp.bfloat16),
                       preferred_element_type=jnp.float32)

    h1 = jnp.maximum(mm(x, params["w1"]) + params["b1"], 0.0)
    h2 = jnp.maximum(mm(h1, params["w2"]) + params["b2"], 0.0)
    ref = (mm(h2, params["w3"]) + params["b3"])[:, :n_output]

    assert out.shape == (B, n_output)
    assert jnp.allclose(out, ref, atol=2e-2, rtol=2e-2)

    print("KERNEL_OK")
</pallas_src>

<mosaic_0001>
module attributes {stable_mosaic.version = 11 : i64} {
  func.func @_dense_mlp_kernel(%arg0: i32, %arg1: memref<8x32xf32, #tpu.memory_space<vmem>>, %arg2: memref<32x128xf32, #tpu.memory_space<vmem>>, %arg3: memref<1x128xf32, #tpu.memory_space<vmem>>, %arg4: memref<128x128xf32, #tpu.memory_space<vmem>>, %arg5: memref<1x128xf32, #tpu.memory_space<vmem>>, %arg6: memref<128x128xf32, #tpu.memory_space<vmem>>, %arg7: memref<1x128xf32, #tpu.memory_space<vmem>>, %arg8: memref<8x16xf32, #tpu.memory_space<vmem>>) attributes {dimension_semantics = [#tpu.dimension_semantics<parallel>], iteration_bounds = array<i64: 1>, scalar_prefetch = 0 : i64, scratch_operands = 0 : i64, tpu.core_type = #tpu.core_type<tc>, window_params = [{transform_indices = @transform_0, window_bounds = array<i64: 8, 32>}, {pipeline_mode = #tpu.pipeline_mode<synchronous>, transform_indices = @transform_1, window_bounds = array<i64: 32, 128>}, {pipeline_mode = #tpu.pipeline_mode<synchronous>, transform_indices = @transform_2, window_bounds = array<i64: 1, 128>}, {pipeline_mode = #tpu.pipeline_mode<synchronous>, transform_indices = @transform_3, window_bounds = array<i64: 128, 128>}, {pipeline_mode = #tpu.pipeline_mode<synchronous>, transform_indices = @transform_4, window_bounds = array<i64: 1, 128>}, {pipeline_mode = #tpu.pipeline_mode<synchronous>, transform_indices = @transform_5, window_bounds = array<i64: 128, 128>}, {pipeline_mode = #tpu.pipeline_mode<synchronous>, transform_indices = @transform_6, window_bounds = array<i64: 1, 128>}, {transform_indices = @transform_7, window_bounds = array<i64: 8, 16>}]} {
    %c0 = arith.constant 0 : index
    %c0_0 = arith.constant 0 : index
    %0 = vector.load %arg1[%c0, %c0_0] : memref<8x32xf32, #tpu.memory_space<vmem>>, vector<8x32xf32>
    %1 = arith.truncf %0 : vector<8x32xf32> to vector<8x32xbf16>
    %c0_1 = arith.constant 0 : index
    %c0_2 = arith.constant 0 : index
    %2 = vector.load %arg2[%c0_1, %c0_2] : memref<32x128xf32, #tpu.memory_space<vmem>>, vector<32x128xf32>
    %3 = arith.truncf %2 : vector<32x128xf32> to vector<32x128xbf16>
    %cst = arith.constant dense<0.000000e+00> : vector<8x128xf32>
    %4 = tpu.matmul %1, %3, %cst {dimension_numbers = #tpu.dot_dimension_numbers<[1], [0], [0], [1], [0, 0, 1, 1], [], []>} : vector<8x32xbf16>, vector<32x128xbf16>, vector<8x128xf32> -> vector<8x128xf32>
    %c0_3 = arith.constant 0 : index
    %c0_4 = arith.constant 0 : index
    %5 = vector.load %arg3[%c0_3, %c0_4] : memref<1x128xf32, #tpu.memory_space<vmem>>, vector<1x128xf32>
    %6 = vector.broadcast %5 : vector<1x128xf32> to vector<8x128xf32>
    %7 = arith.addf %4, %6 : vector<8x128xf32>
    %cst_5 = arith.constant 0.000000e+00 : f32
    %8 = vector.broadcast %cst_5 : f32 to vector<8x128xf32>
    %9 = arith.maximumf %7, %8 : vector<8x128xf32>
    %10 = arith.truncf %9 : vector<8x128xf32> to vector<8x128xbf16>
    %c0_6 = arith.constant 0 : index
    %c0_7 = arith.constant 0 : index
    %11 = vector.load %arg4[%c0_6, %c0_7] : memref<128x128xf32, #tpu.memory_space<vmem>>, vector<128x128xf32>
    %12 = arith.truncf %11 : vector<128x128xf32> to vector<128x128xbf16>
    %cst_8 = arith.constant dense<0.000000e+00> : vector<8x128xf32>
    %13 = tpu.matmul %10, %12, %cst_8 {dimension_numbers = #tpu.dot_dimension_numbers<[1], [0], [0], [1], [0, 0, 1, 1], [], []>} : vector<8x128xbf16>, vector<128x128xbf16>, vector<8x128xf32> -> vector<8x128xf32>
    %c0_9 = arith.constant 0 : index
    %c0_10 = arith.constant 0 : index
    %14 = vector.load %arg5[%c0_9, %c0_10] : memref<1x128xf32, #tpu.memory_space<vmem>>, vector<1x128xf32>
    %15 = vector.broadcast %14 : vector<1x128xf32> to vector<8x128xf32>
    %16 = arith.addf %13, %15 : vector<8x128xf32>
    %cst_11 = arith.constant 0.000000e+00 : f32
    %17 = vector.broadcast %cst_11 : f32 to vector<8x128xf32>
    %18 = arith.maximumf %16, %17 : vector<8x128xf32>
    %19 = arith.truncf %18 : vector<8x128xf32> to vector<8x128xbf16>
    %c0_12 = arith.constant 0 : index
    %c0_13 = arith.constant 0 : index
    %20 = vector.load %arg6[%c0_12, %c0_13] : memref<128x128xf32, #tpu.memory_space<vmem>>, vector<128x128xf32>
    %21 = arith.truncf %20 : vector<128x128xf32> to vector<128x128xbf16>
    %cst_14 = arith.constant dense<0.000000e+00> : vector<8x128xf32>
    %22 = tpu.matmul %19, %21, %cst_14 {dimension_numbers = #tpu.dot_dimension_numbers<[1], [0], [0], [1], [0, 0, 1, 1], [], []>} : vector<8x128xbf16>, vector<128x128xbf16>, vector<8x128xf32> -> vector<8x128xf32>
    %c0_15 = arith.constant 0 : index
    %c0_16 = arith.constant 0 : index
    %23 = vector.load %arg7[%c0_15, %c0_16] : memref<1x128xf32, #tpu.memory_space<vmem>>, vector<1x128xf32>
    %24 = vector.broadcast %23 : vector<1x128xf32> to vector<8x128xf32>
    %25 = arith.addf %22, %24 : vector<8x128xf32>
    %26 = vector.extract_strided_slice %25 {offsets = [0, 0], sizes = [8, 16], strides = [1, 1]} : vector<8x128xf32> to vector<8x16xf32>
    %c0_17 = arith.constant 0 : index
    %c0_18 = arith.constant 0 : index
    %27 = vector.load %arg8[%c0_17, %c0_18] : memref<8x16xf32, #tpu.memory_space<vmem>>, vector<8x16xf32>
    tpu.vector_store %arg8[%c0_17, %c0_18], %26 {strides = array<i32>} : memref<8x16xf32, #tpu.memory_space<vmem>>, vector<8x16xf32>,
    return
  }
  func.func @transform_0(%arg0: i32) -> (i32, i32) {
    %c0_i32 = arith.constant 0 : i32
    %c0_i32_0 = arith.constant 0 : i32
    return %arg0, %c0_i32 : i32, i32
  }
  func.func @transform_1(%arg0: i32) -> (i32, i32) {
    %c0_i32 = arith.constant 0 : i32
    %c0_i32_0 = arith.constant 0 : i32
    %c0_i32_1 = arith.constant 0 : i32
    return %c0_i32, %c0_i32_0 : i32, i32
  }
  func.func @transform_2(%arg0: i32) -> (i32, i32) {
    %c0_i32 = arith.constant 0 : i32
    %c0_i32_0 = arith.constant 0 : i32
    %c0_i32_1 = arith.constant 0 : i32
    return %c0_i32, %c0_i32_0 : i32, i32
  }
  func.func @transform_3(%arg0: i32) -> (i32, i32) {
    %c0_i32 = arith.constant 0 : i32
    %c0_i32_0 = arith.constant 0 : i32
    %c0_i32_1 = arith.constant 0 : i32
    return %c0_i32, %c0_i32_0 : i32, i32
  }
  func.func @transform_4(%arg0: i32) -> (i32, i32) {
    %c0_i32 = arith.constant 0 : i32
    %c0_i32_0 = arith.constant 0 : i32
    %c0_i32_1 = arith.constant 0 : i32
    return %c0_i32, %c0_i32_0 : i32, i32
  }
  func.func @transform_5(%arg0: i32) -> (i32, i32) {
    %c0_i32 = arith.constant 0 : i32
    %c0_i32_0 = arith.constant 0 : i32
    %c0_i32_1 = arith.constant 0 : i32
    return %c0_i32, %c0_i32_0 : i32, i32
  }
  func.func @transform_6(%arg0: i32) -> (i32, i32) {
    %c0_i32 = arith.constant 0 : i32
    %c0_i32_0 = arith.constant 0 : i32
    %c0_i32_1 = arith.constant 0 : i32
    return %c0_i32, %c0_i32_0 : i32, i32
  }
  func.func @transform_7(%arg0: i32) -> (i32, i32) {
    %c0_i32 = arith.constant 0 : i32
    %c0_i32_0 = arith.constant 0 : i32
    return %arg0, %c0_i32 : i32, i32
  }
}

</mosaic_0001>

<bundles_post_ra>
// kernel: tpu_custom_call.1
= control target key start
LH: loop header
LB: loop body
LE: loop exit
PB: predicated region body
PF: predicated region fallthrough
CT: control target
= control target key end

     0   :  { %12 = vsyncpa [#allocation3], 0  ;;  %s656_s0 = inlined_call_operand.hbm [shape: f32[8,32], index: 0, kind: input, shape index: {}]   ;;  %s657_s1 = inlined_call_operand.hbm [shape: f32[32,128], index: 1, kind: input, shape index: {}]   ;;  %s658_s2 = inlined_call_operand.vmem [shape: f32[1,128], index: 2, kind: input, shape index: {}]   ;;  %s659_s3 = inlined_call_operand.hbm [shape: f32[128,128], index: 3, kind: input, shape index: {}]   ;;  %s660_s4 = inlined_call_operand.vmem [shape: f32[1,128], index: 4, kind: input, shape index: {}]   ;;  %s661_s5 = inlined_call_operand.hbm [shape: f32[128,128], index: 5, kind: input, shape index: {}]   ;;  %s662_s6 = inlined_call_operand.vmem [shape: f32[1,128], index: 6, kind: input, shape index: {}]   ;;  %s663_s7 = inlined_call_operand.hbm [shape: f32[8,16], index: 7, kind: output, shape index: {}]  }
   0x1   :  { %13 = vsyncpa [#allocation6], 0 }
   0x2   :  { %14 = vsyncpa [#allocation9], 0 }
   0x3   :  { %15 = vsyncpa [#allocation4], 0  ;;  %s505_s24 = smov [#allocation5]   ;;  %s387_s28 = scalar_lea.hbm %s657_s1, 512 }
   0x4   :  { %s31_s25 = sshll.u32 %s505_s24, 4  ;;  %p388_p0 = scmp.ne.s32.totalorder %s657_s1, %s387_s28  ;;  %s32_s25 = int_to_ptr.vmem [resolvable:$true] %s31_s25 }
   0x5   :  { %p391_p1 = scmp.lt.u32.totalorder %s387_s28, %s657_s1 }
   0x7   :  { %p393_p2 = pnand %p391_p1, %p388_p0 }
   0x9   :  { %396 = shalt.err (!%p393_p2)
}
   0xa   :  { %s397_s10 = scalar_lea.vmem %s32_s25, 512  ;;  %p402_p4 = scmp.lt.s32.totalorder %s32_s25, %s32_s25 }
   0xb   :  { %p398_p3 = scmp.ne.s32.totalorder %s32_s25, %s397_s10  ;;  %p403_p5 = scmp.lt.s32.totalorder %s397_s10, %s397_s10 }
   0xd   :  { %p404_p6 = por %p403_p5, %p402_p4 }
   0xf   :  { %p405_p7 = pnand %p404_p6, %p398_p3 }
  0x11   :  { %408 = shalt.err (!%p405_p7)
}
  0x12   :  { %s506_s11 = smov 128   ;;  %s507_s12 = smov 8  }
  0x13   :  { %37 = dma.hbm_to_vmem [thread:$0]  %s657_s1, 512, %s32_s25, [#allocation6], %s506_s11, %s506_s11, %s507_s12  }
  0x14   :  { %s508_s15 = smov [#allocation2]   ;;  %s509_s17 = smov [#allocation7]  }
  0x15   :  { %s22_s16 = sshll.u32 %s508_s15, 4  ;;  %s45_s18 = sshll.u32 %s509_s17, 4  ;;  %s23_s16 = int_to_ptr.vmem [resolvable:$true] %s22_s16  ;;  %s46_s18 = int_to_ptr.vmem [resolvable:$true] %s45_s18 }
  0x16   :  { %s409_s21 = scalar_lea.hbm %s656_s0, 128 }
  0x17   :  { %p410_p8 = scmp.ne.s32.totalorder %s656_s0, %s409_s21  ;;  %p413_p9 = scmp.lt.u32.totalorder %s409_s21, %s656_s0 }
  0x19   :  { %p415_p10 = pnand %p413_p9, %p410_p8 }
  0x1b   :  { %418 = shalt.err (!%p415_p10)
}
  0x1c   :  { %s419_s1 = scalar_lea.vmem %s23_s16, 128  ;;  %p424_p12 = scmp.lt.s32.totalorder %s23_s16, %s23_s16 }
  0x1d   :  { %p420_p11 = scmp.ne.s32.totalorder %s23_s16, %s419_s1  ;;  %p425_p13 = scmp.lt.s32.totalorder %s419_s1, %s419_s1 }
  0x1f   :  { %p426_p0 = por %p425_p13, %p424_p12 }
  0x21   :  { %p427_p1 = pnand %p426_p0, %p420_p11 }
  0x23   :  { %430 = shalt.err (!%p427_p1)
}
  0x24   :  { %25 = dma.hbm_to_vmem [thread:$0]  %s656_s0, 128, %s23_s16, [#allocation3]  }
  0x25   :  { %s431_s30 = scalar_lea.hbm %s659_s3, 2048 }
  0x26   :  { %p432_p2 = scmp.ne.s32.totalorder %s659_s3, %s431_s30  ;;  %p435_p3 = scmp.lt.u32.totalorder %s431_s30, %s659_s3 }
  0x28   :  { %p437_p4 = pnand %p435_p3, %p432_p2 }
  0x2a   :  { %440 = shalt.err (!%p437_p4)
}
  0x2b   :  { %s441_s14 = scalar_lea.vmem %s46_s18, 2048  ;;  %p446_p6 = scmp.lt.s32.totalorder %s46_s18, %s46_s18 }
  0x2c   :  { %p442_p5 = scmp.ne.s32.totalorder %s46_s18, %s441_s14  ;;  %p447_p7 = scmp.lt.s32.totalorder %s441_s14, %s441_s14 }
  0x2e   :  { %p448_p8 = por %p447_p7, %p446_p6 }
  0x30   :  { %p449_p9 = pnand %p448_p8, %p442_p5 }
  0x32   :  { %452 = shalt.err (!%p449_p9)
}
  0x33   :  { %51 = dma.hbm_to_vmem [thread:$0]  %s659_s3, 2048, %s46_s18, [#allocation6], %s506_s11, %s506_s11, %s507_s12  }
  0x34   :  { %s510_s16 = smov [#allocation8]   ;;  %s453_s21 = scalar_lea.hbm %s661_s5, 2048 }
  0x35   :  { %s59_s17 = sshll.u32 %s510_s16, 4  ;;  %p454_p10 = scmp.ne.s32.totalorder %s661_s5, %s453_s21  ;;  %s60_s17 = int_to_ptr.vmem [resolvable:$true] %s59_s17 }
  0x36   :  { %p457_p11 = scmp.lt.u32.totalorder %s453_s21, %s661_s5 }
  0x38   :  { %p459_p12 = pnand %p457_p11, %p454_p10 }
  0x3a   :  { %462 = shalt.err (!%p459_p12)
}
  0x3b   :  { %s463_s1 = scalar_lea.vmem %s60_s17, 2048  ;;  %p468_p0 = scmp.lt.s32.totalorder %s60_s17, %s60_s17 }
  0x3c   :  { %p464_p13 = scmp.ne.s32.totalorder %s60_s17, %s463_s1  ;;  %p469_p1 = scmp.lt.s32.totalorder %s463_s1, %s463_s1 }
  0x3e   :  { %p470_p2 = por %p469_p1, %p468_p0 }
  0x40   :  { %p471_p3 = pnand %p470_p2, %p464_p13 }
  0x42   :  { %474 = shalt.err (!%p471_p3)
}
  0x43   :  { %65 = dma.hbm_to_vmem [thread:$0]  %s661_s5, 2048, %s60_s17, [#allocation9], %s506_s11, %s506_s11, %s507_s12  }
  0x44   :  { %497 = dma.done.wait [#allocation3], 128  }
  0x45   :  { %498 = vsyncadd [#allocation3], 4294967168 }
  0x46   :  { %499 = dma.done.wait [#allocation6], 2560  }
  0x47   :  { %500 = vsyncadd [#allocation6], 4294964736 }
  0x48   :  { %501 = dma.done.wait [#allocation9], 2048  }
  0x49   :  { %502 = vsyncadd [#allocation9], 4294965248  ;;  %v511_v0 = vmov 0.0   ;;  %vm512_vm0 = vmmov 0   ;;  %v83_v1 = vld [vmem:[#allocation5] sm:$0xff]  ;;  %v84_v2 = vld [vmem:[#allocation5 + $0x8] sm:$0xff] }
  0x4a   :  { %330 = vmatprep.subr.bf16.mxu0 %v511_v0  ;;  %334 = vmatprep.mubr.msk.bf16.mxu0 %vm512_vm0, %v511_v0  ;;  %v85_v3 = vld [vmem:[#allocation5 + $0x10] sm:$0xff]  ;;  %v87_v4 = vpack.c.bf16 %v84_v2, %v83_v1  ;;  %v86_v5 = vld [vmem:[#allocation5 + $0x18] sm:$0xff]  ;;  %v142_v6 = vld [vmem:[#allocation7] sm:$0xff]  ;;  %vm96_vm1 = vcmask 261120   ;;  %s513_s28 = smov [#allocation10]   ;;  %vm286_vm2 = vcmask 130048  }
  0x4b   :  { %338 = vmatprep.subr.bf16.mxu1 %v511_v0  ;;  %354 = vmatprep.mubr.msk.bf16.mxu1 %vm512_vm0, %v511_v0  ;;  %v143_v7 = vld [vmem:[#allocation7 + $0x8] sm:$0xff]  ;;  %v144_v8 = vld [vmem:[#allocation7 + $0x10] sm:$0xff]  ;;  %v145_v9 = vld [vmem:[#allocation7 + $0x18] sm:$0xff]  ;;  %v88_v10 = vpack.c.bf16 %v86_v5, %v85_v3  ;;  %s294_s29 = sshll.u32 %s513_s28, 4  ;;  %s295_s29 = int_to_ptr.vmem [resolvable:$true] %s294_s29 }
  0x4c   :  { %331 = vmatpush3.bf16.msra.mxu0 %v87_v4  ;;  %v81_v11 = vld [vmem:[#allocation2] sm:$0xff]  ;;  %v158_v12 = vpack.c.bf16 %v143_v7, %v142_v6  ;;  %v159_v13 = vpack.c.bf16 %v145_v9, %v144_v8  ;;  %v146_v15 = vld [vmem:[#allocation7 + $0x20] sm:$0xff]  ;;  %v147_v16 = vld [vmem:[#allocation7 + $0x28] sm:$0xff]  ;;  %p480_p5 = scmp.lt.s32.totalorder %s295_s29, %s295_s29 }
  0x4d   :  { %332 = vmatprep.subr.bf16.mxu0 %v511_v0  ;;  %v82_v14 = vpack.c.bf16 %v81_v11, %v81_v11  ;;  %v160_v17 = vpack.c.bf16 %v147_v16, %v146_v15  ;;  %v148_v18 = vld [vmem:[#allocation7 + $0x30] sm:$0xff]  ;;  %v149_v19 = vld [vmem:[#allocation7 + $0x38] sm:$0xff]  ;;  %v150_v21 = vld [vmem:[#allocation7 + $0x40] sm:$0xff] }
  0x4e   :  { %339 = vmatpush3.bf16.msra.mxu1 %v158_v12  ;;  %v161_v20 = vpack.c.bf16 %v149_v19, %v148_v18  ;;  %v151_v22 = vld [vmem:[#allocation7 + $0x48] sm:$0xff]  ;;  %v152_v24 = vld [vmem:[#allocation7 + $0x50] sm:$0xff]  ;;  %v153_v25 = vld [vmem:[#allocation7 + $0x58] sm:$0xff] }
  0x4f   :  { %340 = vmatprep.subr.bf16.mxu1 %v511_v0  ;;  %v162_v23 = vpack.c.bf16 %v151_v22, %v150_v21  ;;  %v163_v26 = vpack.c.bf16 %v153_v25, %v152_v24  ;;  %v154_v27 = vld [vmem:[#allocation7 + $0x60] sm:$0xff]  ;;  %v155_v28 = vld [vmem:[#allocation7 + $0x68] sm:$0xff]  ;;  %v156_v30 = vld [vmem:[#allocation7 + $0x70] sm:$0xff] }
  0x50   :  { %333 = vmatpush3.bf16.msra.mxu0 %v88_v10  ;;  %v164_v29 = vpack.c.bf16 %v155_v28, %v154_v27  ;;  %v157_v31 = vld [vmem:[#allocation7 + $0x78] sm:$0xff]  ;;  %v215_v33 = vld [vmem:[#allocation8] sm:$0xff]  ;;  %v216_v34 = vld [vmem:[#allocation8 + $0x8] sm:$0xff] }
  0x51   :  { %358 = vmatprep.subr.bf16.mxu0 %v511_v0  ;;  %v165_v32 = vpack.c.bf16 %v157_v31, %v156_v30  ;;  %v217_v35 = vld [vmem:[#allocation8 + $0x10] sm:$0xff]  ;;  %v231_v36 = vpack.c.bf16 %v216_v34, %v215_v33  ;;  %v218_v37 = vld [vmem:[#allocation8 + $0x18] sm:$0xff]  ;;  %v219_v39 = vld [vmem:[#allocation8 + $0x20] sm:$0xff] }
  0x52   :  { %341 = vmatpush3.bf16.msra.mxu1 %v159_v13  ;;  %v232_v38 = vpack.c.bf16 %v218_v37, %v217_v35  ;;  %v220_v40 = vld [vmem:[#allocation8 + $0x28] sm:$0xff]  ;;  %v221_v42 = vld [vmem:[#allocation8 + $0x30] sm:$0xff]  ;;  %v222_v43 = vld [vmem:[#allocation8 + $0x38] sm:$0xff] }
  0x53   :  { %335 = vmatmul.mubr.msk.bf16.vlgmr.msra.gmra.mrb[0].mxu0 %vm96_vm1, %v82_v14  ;;  %342 = vmatprep.subr.bf16.mxu1 %v511_v0  ;;  %v233_v41 = vpack.c.bf16 %v220_v40, %v219_v39  ;;  %v234_v44 = vpack.c.bf16 %v222_v43, %v221_v42  ;;  %v223_v45 = vld [vmem:[#allocation8 + $0x40] sm:$0xff]  ;;  %v224_v46 = vld [vmem:[#allocation8 + $0x48] sm:$0xff]  ;;  %v225_v48 = vld [vmem:[#allocation8 + $0x50] sm:$0xff] }
  0x54   :  { %374 = vmatprep.mubr.msk.bf16.mxu0 %vm512_vm0, %v511_v0  ;;  %359 = vmatpush3.bf16.msra.mxu0 %v231_v36  ;;  %v235_v47 = vpack.c.bf16 %v224_v46, %v223_v45  ;;  %v226_v49 = vld [vmem:[#allocation8 + $0x58] sm:$0xff]  ;;  %v227_v59 = vld [vmem:[#allocation8 + $0x60] sm:$0xff]  ;;  %v228_v60 = vld [vmem:[#allocation8 + $0x68] sm:$0xff] }
  0x55   :  { %360 = vmatprep.subr.bf16.mxu0 %v511_v0  ;;  %v236_v50 = vpack.c.bf16 %v226_v49, %v225_v48  ;;  %v305_v51 = vld [vmem:[%s658_s2] ss:$0 sm:$0xff]  ;;  %v237_v61 = vpack.c.bf16 %v228_v60, %v227_v59  ;;  %v229_v62 = vld [vmem:[#allocation8 + $0x70] sm:$0xff] }
  0x56   :  { %343 = vmatpush3.bf16.msra.mxu1 %v160_v17  ;;  %v230_v63 = vld [vmem:[#allocation8 + $0x78] sm:$0xff] }
  0x57   :  { %344 = vmatprep.subr.bf16.mxu1 %v511_v0  ;;  %v238_v1 = vpack.c.bf16 %v230_v63, %v229_v62  ;;  %v307_v2 = vld [vmem:[%s660_s4] ss:$0 sm:$0xff]  ;;  %s475_s4 = scalar_lea.vmem %s295_s29, 128 }
  0x58   :  { %361 = vmatpush3.bf16.msra.mxu0 %v232_v38  ;;  %p476_p4 = scmp.ne.s32.totalorder %s295_s29, %s475_s4  ;;  %p481_p6 = scmp.lt.s32.totalorder %s475_s4, %s475_s4 }
  0x59   :  { %362 = vmatprep.subr.bf16.mxu0 %v511_v0 }
  0x5a   :  { %345 = vmatpush3.bf16.msra.mxu1 %v161_v20  ;;  %p482_p7 = por %p481_p6, %p480_p5 }
  0x5b   :  { %346 = vmatprep.subr.bf16.mxu1 %v511_v0 }
  0x5c   :  { %363 = vmatpush3.bf16.msra.mxu0 %v233_v41  ;;  %p483_p8 = pnand %p482_p7, %p476_p4 }
  0x5d   :  { %364 = vmatprep.subr.bf16.mxu0 %v511_v0 }
  0x5e   :  { %347 = vmatpush3.bf16.msra.mxu1 %v162_v23 }
  0x5f   :  { %348 = vmatprep.subr.bf16.mxu1 %v511_v0 }
  0x60   :  { %365 = vmatpush3.bf16.msra.mxu0 %v234_v44 }
  0x61   :  { %366 = vmatprep.subr.bf16.mxu0 %v511_v0 }
  0x62   :  { %349 = vmatpush3.bf16.msra.mxu1 %v163_v26 }
  0x63   :  { %350 = vmatprep.subr.bf16.mxu1 %v511_v0 }
  0x64   :  { %367 = vmatpush3.bf16.msra.mxu0 %v235_v47 }
  0x65   :  { %368 = vmatprep.subr.bf16.mxu0 %v511_v0 }
  0x66   :  { %351 = vmatpush3.bf16.msra.mxu1 %v164_v29 }
  0x67   :  { %352 = vmatprep.subr.bf16.mxu1 %v511_v0 }
  0x68   :  { %369 = vmatpush3.bf16.msra.mxu0 %v236_v50 }
  0x69   :  { %370 = vmatprep.subr.bf16.mxu0 %v511_v0 }
  0x6a   :  { %353 = vmatpush3.bf16.msra.mxu1 %v165_v32 }
  0x6c   :  { %371 = vmatpush3.bf16.msra.mxu0 %v237_v61 }
  0x6d   :  { %372 = vmatprep.subr.bf16.mxu0 %v511_v0  ;;  %v308_v0 = vld [vmem:[%s662_s6] ss:$0 sm:$0xff] }
  0x70   :  { %373 = vmatpush3.bf16.msra.mxu0 %v238_v1 }
 0x126   :  { %v134_v52 = vpop.f32.mrb[0].mxu0 }
 0x127   :  { %v135_v53 = vadd.f32 %v305_v51, %v134_v52  ;;  %v336_v54 = vpop.f32.mrb[1].mxu0 }
 0x128   :  { %v137_v55 = vpop.f32.mrb[2].mxu0 }
 0x129   :  { %v140_v56 = vmax.f32 %v135_v53, 0.0  ;;  %v337_v57 = vpop.f32.mrb[3].mxu0 }
 0x12b   :  { %v141_v58 = vpack.c.bf16 %v140_v56, %v140_v56 }
 0x12d   :  { %355 = vmatmul.mubr.bf16.vlgmr.msra.gmra.mrb[0].mxu1 %v141_v58 }
 0x200   :  { %v207_v3 = vpop.f32.mrb[0].mxu1 }
 0x201   :  { %v208_v4 = vadd.f32 %v307_v2, %v207_v3  ;;  %v356_v5 = vpop.f32.mrb[1].mxu1 }
 0x202   :  { %v210_v6 = vpop.f32.mrb[2].mxu1 }
 0x203   :  { %v213_v7 = vmax.f32 %v208_v4, 0.0  ;;  %v357_v8 = vpop.f32.mrb[3].mxu1 }
 0x205   :  { %v214_v9 = vpack.c.bf16 %v213_v7, %v213_v7 }
 0x207   :  { %375 = vmatmul.mubr.bf16.vlgmr.msra.gmra.mrb[4].mxu0 %v214_v9 }
 0x2da   :  { %v280_v10 = vpop.f32.mrb[4].mxu0 }
 0x2db   :  { %v281_v11 = vadd.f32 %v308_v0, %v280_v10  ;;  %v376_v12 = vpop.f32.mrb[5].mxu0 }
 0x2dc   :  { %v283_v13 = vpop.f32.mrb[6].mxu0 }
 0x2dd   :  { %v377_v14 = vpop.f32.mrb[7].mxu0  ;;  %287 = vst.msk [vmem:[#allocation10] sm:$0xff] %vm286_vm2, %v281_v11 }
 0x2de   :  { %486 = shalt.err (!%p483_p8)
}
 0x2df   :  { %s487_s6 = scalar_lea.hbm %s663_s7, 128 }
 0x2e0   :  { %p488_p9 = scmp.ne.s32.totalorder %s663_s7, %s487_s6  ;;  %p491_p10 = scmp.lt.u32.totalorder %s487_s6, %s663_s7 }
 0x2e2   :  { %p493_p11 = pnand %p491_p10, %p488_p9 }
 0x2e4   :  { %496 = shalt.err (!%p493_p11)
}
 0x2e5   :  { %297 = dma.vmem_to_hbm [thread:$0]  %s295_s29, 128, %s663_s7, [#allocation4]  }
 0x2e6   :  { %503 = dma.done.wait [#allocation4], 128  }
 0x2e7   :  { %504 = vsyncadd [#allocation4], 4294967168 }
 0x2e8   :  { %301 = vsyncpa [#allocation3], 1 }
 0x2e9   :  { %302 = vsyncpa [#allocation6], 1 }
 0x2ea   :  { %303 = vsyncpa [#allocation9], 1 }
 0x2eb   :  { %304 = vsyncpa [#allocation4], 1 }

</bundles_post_ra>
